<compile_context>
chip_gen: v7x
topology: tpu7x:2x2x1
jax: 0.10.0
libtpu: 0.0.40
codegen_flags: <defaults>
</compile_context>

<pallas_src>
import jax
import jax.numpy as jnp
import numpy as np
from jax.experimental import pallas as pl
from jax.experimental.pallas import tpu as pltpu


# ----------------------------- Pallas kernel ------------------------------ #
def _lstm_recurrence_kernel(
    x0_ref,        # (U*B, 4H) f32  precomputed layer-0 input gates, order [i,f,o,g]
    state_in_ref,  # (B, 4H)  f32   initial packed state [h0 | h1 | c0 | c1]
    w_hh0_ref,     # (H, 4H)  f32   lstm.weight_hh_l0.T (gate-reordered)
    w_ih1_ref,     # (H, 4H)  f32   lstm.weight_ih_l1.T (gate-reordered)
    w_hh1_ref,     # (H, 4H)  f32   lstm.weight_hh_l1.T (gate-reordered)
    cat_ref,       # (U*B, 2H) f32  per-step [h0 | h1] (out_layer input slab)
    state_ref,     # (B, 4H)  f32   resident state carry / final output
):
    win = pl.program_id(0)
    B = state_in_ref.shape[0]
    H = w_hh0_ref.shape[0]
    U = x0_ref.shape[0] // B

    @pl.when(win == 0)
    def _():
        state_ref[...] = state_in_ref[...]

    st = state_ref[...]
    h0, h1 = st[:, 0:H], st[:, H:2 * H]
    c0, c1 = st[:, 2 * H:3 * H], st[:, 3 * H:4 * H]

    # Resident weights: loaded once per grid step, no per-step dtype casts.
    w_hh0 = w_hh0_ref[...]
    w_ih1 = w_ih1_ref[...]
    w_hh1 = w_hh1_ref[...]
    x0_all = x0_ref[...]            # single full-block (U*B, 4H) load

    def activate(gates):
        # Gate order [i, f, o, g]: one sigmoid over 3H lanes + one tanh over H.
        sig = jax.nn.sigmoid(gates[:, :3 * H])
        g = jnp.tanh(gates[:, 3 * H:])
        return sig[:, 0:H], sig[:, H:2 * H], sig[:, 2 * H:3 * H], g

    cat_steps = []
    for j in range(U):              # compile-time unrolled window recurrence
        # Layer 0: input contribution was hoisted; only h @ w_hh is recurrent.
        gates0 = x0_all[j * B:(j + 1) * B, :] + jnp.dot(
            h0, w_hh0, preferred_element_type=jnp.float32)
        i0, f0, o0, g0 = activate(gates0)
        c0 = f0 * c0 + i0 * g0
        h0 = o0 * jnp.tanh(c0)

        # TODO(synk): nn.LSTM inter-layer dropout (p=0.3) is train-only; the
        # inference forward path omits it.
        gates1 = (jnp.dot(h0, w_ih1, preferred_element_type=jnp.float32)
                  + jnp.dot(h1, w_hh1, preferred_element_type=jnp.float32))
        i1, f1, o1, g1 = activate(gates1)
        c1 = f1 * c1 + i1 * g1
        h1 = o1 * jnp.tanh(c1)

        cat_steps.append(jnp.concatenate([h0, h1], axis=-1))  # (B, 2H)

    # One sublane-dense store of the whole window's out_layer input slab.
    cat_ref[...] = jnp.concatenate(cat_steps, axis=0)          # (U*B, 2H)
    # Lane-dense packed state carry (single unmasked 128-lane-wide store).
    state_ref[...] = jnp.concatenate([h0, h1, c0, c1], axis=-1)


# ------------------------------- wrappers ---------------------------------- #
def _pick_unroll(T, B):
    """Largest window U dividing T whose (U*B) block is sublane-legal."""
    for u in (8, 4, 2, 1):
        if T % u == 0 and (u * B) % 8 == 0:
            return u
    return T   # single window: block == full array, always legal


def generator_forward_seq(events, hidden, packed, unroll=None):
    """Fused multi-step forward.

    events: (T, B) int32 event indices (teacher-forced / pre-sampled).
    hidden: (h, c), each (2, B, H) f32.
    Returns (logits (T, B, V) f32, (h_new, c_new) each (2, B, H) f32).
    """
    h, c = hidden
    T, B = events.shape
    H = h.shape[-1]
    V = packed["w_out"].shape[1]

    U = _pick_unroll(T, B) if unroll is None else unroll
    assert T % U == 0 and ((U * B) % 8 == 0 or U == T), (T, B, U)

    # ---- Hoisted pre-stage (non-recurrent, big-M, plain XLA / full MXU) ----
    x = jnp.take(packed["embedding"], events.reshape(-1), axis=0)   # (T*B, E)
    x = x @ packed["w_in"] + packed["b_in"]                         # (T*B, H)
    x = jnp.where(x >= 0, x, 0.1 * x)                               # LeakyReLU(0.1)
    x0 = x @ packed["w_ih0"]                                        # (T*B, 4H), [i,f,o,g]

    # Lane-dense packed initial state [h0 | h1 | c0 | c1].
    state_in = jnp.concatenate([h[0], h[1], c[0], c[1]], axis=-1)   # (B, 4H)

    const = lambda i: (0, 0)   # resident blocks: DMA'd once, stay in VMEM

    grid_spec = pltpu.PrefetchScalarGridSpec(
        num_scalar_prefetch=0,
        grid=(T // U,),
        in_specs=[
            pl.BlockSpec((U * B, 4 * H), lambda i: (i, 0)),   # X0 window
            pl.BlockSpec((B, 4 * H), const),                  # initial state
            pl.BlockSpec((H, 4 * H), const),                  # w_hh0
            pl.BlockSpec((H, 4 * H), const),                  # w_ih1
            pl.BlockSpec((H, 4 * H), const),                  # w_hh1
        ],
        out_specs=(
            pl.BlockSpec((U * B, 2 * H), lambda i: (i, 0)),   # cat_h slab
            pl.BlockSpec((B, 4 * H), const),                  # final packed state
        ),
    )

    cat_h, state = pl.pallas_call(
        _lstm_recurrence_kernel,
        grid_spec=grid_spec,
        out_shape=(
            jax.ShapeDtypeStruct((T * B, 2 * H), jnp.float32),
            jax.ShapeDtypeStruct((B, 4 * H), jnp.float32),
        ),
        compiler_params=pltpu.CompilerParams(
            dimension_semantics=("arbitrary",),   # sequential recurrence over time
        ),
    )(x0, state_in, packed["w_hh0"], packed["w_ih1"], packed["w_hh1"])

    # ---- Hoisted post-stage: out_layer as one big-M matmul ----
    logits = (cat_h @ packed["w_out"] + packed["b_out"]).reshape(T, B, V)

    h_new = jnp.stack([state[:, 0:H], state[:, H:2 * H]])
    c_new = jnp.stack([state[:, 2 * H:3 * H], state[:, 3 * H:4 * H]])
    return logits, (h_new, c_new)


def generator_forward(event, hidden, packed):
    """Single-step forward matching Generator.forward: event (1, B) int."""
    return generator_forward_seq(event, hidden, packed, unroll=1)


# --------------------------- pure-JAX reference ----------------------------- #
def _reference_forward_seq(events, hidden, params):
    """Straightforward f32 reference in PyTorch gate order [i, f, g, o].

    NOTE: it uses the same f32 parameters as the kernel path, so it verifies
    the kernel math exactly; quantization vs. an original f32 PyTorch
    checkpoint is not introduced anywhere in this implementation.
    """
    H = params["w_hh0"].shape[0]
    emb, w_in, b_in = params["embedding"], params["w_in"], params["b_in"]
    w_out, b_out = params["w_out"], params["b_out"]

    h, c = hidden
    h0, h1, c0, c1 = h[0], h[1], c[0], c[1]

    def cell(inp, hp, cp, wih, whh):
        g = inp @ wih + hp @ whh
        i = jax.nn.sigmoid(g[:, :H])
        f = jax.nn.sigmoid(g[:, H:2 * H])
        gg = jnp.tanh(g[:, 2 * H:3 * H])
        o = jax.nn.sigmoid(g[:, 3 * H:])
        cn = f * cp + i * gg
        return o * jnp.tanh(cn), cn

    outs = []
    for t in range(events.shape[0]):
        x = emb[events[t]]
        x = x @ w_in + b_in
        x = jnp.where(x >= 0, x, 0.1 * x)
        h0, c0 = cell(x, h0, c0, params["w_ih0"], params["w_hh0"])
        h1, c1 = cell(h0, h1, c1, params["w_ih1"], params["w_hh1"])
        outs.append(jnp.concatenate([h0, h1], -1) @ w_out + b_out)
    logits = jnp.stack(outs, 0)
    return logits, (jnp.stack([h0, h1]), jnp.stack([c0, c1]))


# ------------------------------ param init --------------------------------- #
def _xavier(key, shape):
    fan_in, fan_out = shape
    std = float(np.sqrt(2.0 / (fan_in + fan_out)))
    return jax.random.normal(key, shape, dtype=jnp.float32) * std


def init_params(key, in_dim, hidden_dim, out_dim, num_layers=2):
    # Weights stored pre-transposed relative to PyTorch (i.e. weight.T) in the
    # native PyTorch gate order [i, f, g, o]; a real checkpoint import must
    # transpose in_layer / lstm / out_layer weights.
    assert in_dim == out_dim, "embedding feature dim feeds in_layer"
    ks = jax.random.split(key, 10)
    H, E, V = hidden_dim, in_dim, out_dim
    return {
        "embedding": _xavier(ks[0], (V, E)),           # nn.Embedding(V, V)
        "w_in":  _xavier(ks[1], (E, H)),               # in_layer.weight.T
        "b_in":  0.01 * jax.random.normal(ks[2], (1, H), jnp.float32),
        "w_ih0": _xavier(ks[3], (H, 4 * H)),           # lstm.weight_ih_l0.T
        "w_hh0": _xavier(ks[4], (H, 4 * H)),           # lstm.weight_hh_l0.T
        "w_ih1": _xavier(ks[5], (H, 4 * H)),           # lstm.weight_ih_l1.T
        "w_hh1": _xavier(ks[6], (H, 4 * H)),           # lstm.weight_hh_l1.T
        "w_out": _xavier(ks[7], (num_layers * H, V)),  # out_layer.weight.T
        "b_out": 0.01 * jax.random.normal(ks[8], (1, V), jnp.float32),
    }


def _reorder_gates(w, H):
    """Reorder gate columns [i | f | g | o] -> [i | f | o | g]."""
    return jnp.concatenate([w[:, 0:H], w[:, H:2 * H], w[:, 3 * H:4 * H],
                            w[:, 2 * H:3 * H]], axis=-1)


def pack_params(params):
    """Kernel-ready parameter set.

    Gate columns of all LSTM matrices are reordered to [i, f, o, g] so the
    kernel activates with one sigmoid (3H lanes) + one tanh (H lanes).
    Everything stays f32: the three recurrent matrices are tiny VMEM-resident
    blocks (48 KB at H=32), so there is no per-step cast work anywhere and
    the numerics match the f32 reference exactly.  (At production H, store
    w_hh0/w_ih1/w_hh1 in bf16 and cast only the (B,H) h operand at the dot.)
    """
    H = params["w_hh0"].shape[0]
    ro = lambda w: _reorder_gates(w, H)
    return {
        "embedding": params["embedding"],
        "w_in": params["w_in"],
        "b_in": params["b_in"],
        "w_ih0": ro(params["w_ih0"]),
        "w_hh0": ro(params["w_hh0"]),
        "w_ih1": ro(params["w_ih1"]),
        "w_hh1": ro(params["w_hh1"]),
        "w_out": params["w_out"],
        "b_out": params["b_out"],
    }


# --------------------------------- main ------------------------------------ #
if __name__ == "__main__":
    B, H, V = 4, 32, 128          # batch, hidden_dim, out_dim (= in_dim)
    T = 8                         # fused decode steps
    NUM_LAYERS = 2

    key = jax.random.PRNGKey(0)
    k_par, k_h, k_c, k_ev = jax.random.split(key, 4)
    params = init_params(k_par, in_dim=V, hidden_dim=H, out_dim=V,
                         num_layers=NUM_LAYERS)
    packed = pack_params(params)

    # Teacher-forced event sequence; step 0 is the primary event (V - 1),
    # mirroring get_primary_event().  Nonzero random hidden state exercises
    # the w_hh recurrence path.
    events = jax.random.randint(k_ev, (T, B), 0, V, dtype=jnp.int32)
    events = events.at[0].set(V - 1)
    h0 = jax.random.normal(k_h, (NUM_LAYERS, B, H), jnp.float32) * 0.5
    c0 = jax.random.normal(k_c, (NUM_LAYERS, B, H), jnp.float32) * 0.5

    fwd = jax.jit(generator_forward_seq, static_argnames=("unroll",))
    # U=4 -> grid=(2,): exercises the cross-window resident state carry.
    logits, (h_new, c_new) = fwd(events, (h0, c0), packed, unroll=4)
    jax.block_until_ready((logits, h_new, c_new))

    # correctness check against the pure-JAX f32 reference
    ref_logits, (ref_h, ref_c) = _reference_forward_seq(events, (h0, c0), params)
    np.testing.assert_allclose(np.asarray(logits), np.asarray(ref_logits),
                               rtol=1e-3, atol=1e-3)
    np.testing.assert_allclose(np.asarray(h_new), np.asarray(ref_h),
                               rtol=1e-3, atol=1e-3)
    np.testing.assert_allclose(np.asarray(c_new), np.asarray(ref_c),
                               rtol=1e-3, atol=1e-3)

    # single-step call matching Generator.forward(event, hidden)
    step_logits, (h_s, c_s) = generator_forward(events[:1], (h0, c0), packed)
    jax.block_until_ready(step_logits)
    ref_step_logits, _ = _reference_forward_seq(events[:1], (h0, c0), params)
    np.testing.assert_allclose(np.asarray(step_logits),
                               np.asarray(ref_step_logits),
                               rtol=1e-3, atol=1e-3)

    assert logits.shape == (T, B, V)
    assert h_new.shape == (NUM_LAYERS, B, H) and c_new.shape == (NUM_LAYERS, B, H)
    assert step_logits.shape == (1, B, V)
    print("KERNEL_OK")
</pallas_src>

<mosaic_0001>
module attributes {stable_mosaic.version = 11 : i64} {
  func.func @_lstm_recurrence_kernel(%arg0: i32, %arg1: memref<16x128xf32, #tpu.memory_space<vmem>>, %arg2: memref<4x128xf32, #tpu.memory_space<vmem>>, %arg3: memref<32x128xf32, #tpu.memory_space<vmem>>, %arg4: memref<32x128xf32, #tpu.memory_space<vmem>>, %arg5: memref<32x128xf32, #tpu.memory_space<vmem>>, %arg6: memref<16x64xf32, #tpu.memory_space<vmem>>, %arg7: memref<4x128xf32, #tpu.memory_space<vmem>>) attributes {dimension_semantics = [#tpu.dimension_semantics<arbitrary>], iteration_bounds = array<i64: 2>, scalar_prefetch = 0 : i64, scratch_operands = 0 : i64, tpu.core_type = #tpu.core_type<tc>, window_params = [{transform_indices = @transform_0, window_bounds = array<i64: 16, 128>}, {pipeline_mode = #tpu.pipeline_mode<synchronous>, transform_indices = @transform_1, window_bounds = array<i64: 4, 128>}, {pipeline_mode = #tpu.pipeline_mode<synchronous>, transform_indices = @transform_2, window_bounds = array<i64: 32, 128>}, {pipeline_mode = #tpu.pipeline_mode<synchronous>, transform_indices = @transform_3, window_bounds = array<i64: 32, 128>}, {pipeline_mode = #tpu.pipeline_mode<synchronous>, transform_indices = @transform_4, window_bounds = array<i64: 32, 128>}, {transform_indices = @transform_5, window_bounds = array<i64: 16, 64>}, {pipeline_mode = #tpu.pipeline_mode<synchronous>, transform_indices = @transform_6, window_bounds = array<i64: 4, 128>}]} {
    %c0_i32 = arith.constant 0 : i32
    %0 = arith.cmpi eq, %arg0, %c0_i32 : i32
    %1 = arith.extui %0 : i1 to i32
    %c0_i32_0 = arith.constant 0 : i32
    %2 = arith.cmpi ne, %1, %c0_i32_0 : i32
    scf.if %2 {
      %c0_33 = arith.constant 0 : index
      %c0_34 = arith.constant 0 : index
      %172 = vector.load %arg2[%c0_33, %c0_34] : memref<4x128xf32, #tpu.memory_space<vmem>>, vector<4x128xf32>
      %c0_35 = arith.constant 0 : index
      %c0_36 = arith.constant 0 : index
      %173 = vector.load %arg7[%c0_35, %c0_36] : memref<4x128xf32, #tpu.memory_space<vmem>>, vector<4x128xf32>
      tpu.vector_store %arg7[%c0_35, %c0_36], %172 {strides = array<i32>} : memref<4x128xf32, #tpu.memory_space<vmem>>, vector<4x128xf32>,
    } else {
    }
    %c0 = arith.constant 0 : index
    %c0_1 = arith.constant 0 : index
    %3 = vector.load %arg7[%c0, %c0_1] : memref<4x128xf32, #tpu.memory_space<vmem>>, vector<4x128xf32>
    %4 = vector.extract_strided_slice %3 {offsets = [0, 0], sizes = [4, 32], strides = [1, 1]} : vector<4x128xf32> to vector<4x32xf32>
    %5 = vector.extract_strided_slice %3 {offsets = [0, 32], sizes = [4, 32], strides = [1, 1]} : vector<4x128xf32> to vector<4x32xf32>
    %6 = vector.extract_strided_slice %3 {offsets = [0, 64], sizes = [4, 32], strides = [1, 1]} : vector<4x128xf32> to vector<4x32xf32>
    %7 = vector.extract_strided_slice %3 {offsets = [0, 96], sizes = [4, 32], strides = [1, 1]} : vector<4x128xf32> to vector<4x32xf32>
    %c0_2 = arith.constant 0 : index
    %c0_3 = arith.constant 0 : index
    %8 = vector.load %arg3[%c0_2, %c0_3] : memref<32x128xf32, #tpu.memory_space<vmem>>, vector<32x128xf32>
    %c0_4 = arith.constant 0 : index
    %c0_5 = arith.constant 0 : index
    %9 = vector.load %arg4[%c0_4, %c0_5] : memref<32x128xf32, #tpu.memory_space<vmem>>, vector<32x128xf32>
    %c0_6 = arith.constant 0 : index
    %c0_7 = arith.constant 0 : index
    %10 = vector.load %arg5[%c0_6, %c0_7] : memref<32x128xf32, #tpu.memory_space<vmem>>, vector<32x128xf32>
    %c0_8 = arith.constant 0 : index
    %c0_9 = arith.constant 0 : index
    %11 = vector.load %arg1[%c0_8, %c0_9] : memref<16x128xf32, #tpu.memory_space<vmem>>, vector<16x128xf32>
    %12 = vector.extract_strided_slice %11 {offsets = [0, 0], sizes = [4, 128], strides = [1, 1]} : vector<16x128xf32> to vector<4x128xf32>
    %cst = arith.constant dense<0.000000e+00> : vector<4x128xf32>
    %13 = tpu.matmul %4, %8, %cst {dimension_numbers = #tpu.dot_dimension_numbers<[1], [0], [0], [1], [0, 0, 1, 1], [], []>} : vector<4x32xf32>, vector<32x128xf32>, vector<4x128xf32> -> vector<4x128xf32>
    %14 = arith.addf %12, %13 : vector<4x128xf32>
    %15 = vector.extract_strided_slice %14 {offsets = [0, 0], sizes = [4, 96], strides = [1, 1]} : vector<4x128xf32> to vector<4x96xf32>
    %16 = arith.negf %15 : vector<4x96xf32>
    %17 = math.exp %16 : vector<4x96xf32>
    %cst_10 = arith.constant 1.000000e+00 : f32
    %18 = vector.broadcast %cst_10 : f32 to vector<4x96xf32>
    %19 = arith.addf %18, %17 : vector<4x96xf32>
    %20 = arith.divf %18, %19 : vector<4x96xf32>
    %21 = vector.extract_strided_slice %14 {offsets = [0, 96], sizes = [4, 32], strides = [1, 1]} : vector<4x128xf32> to vector<4x32xf32>
    %22 = math.tanh %21 : vector<4x32xf32>
    %23 = vector.extract_strided_slice %20 {offsets = [0, 0], sizes = [4, 32], strides = [1, 1]} : vector<4x96xf32> to vector<4x32xf32>
    %24 = vector.extract_strided_slice %20 {offsets = [0, 32], sizes = [4, 32], strides = [1, 1]} : vector<4x96xf32> to vector<4x32xf32>
    %25 = vector.extract_strided_slice %20 {offsets = [0, 64], sizes = [4, 32], strides = [1, 1]} : vector<4x96xf32> to vector<4x32xf32>
    %26 = arith.mulf %24, %6 : vector<4x32xf32>
    %27 = arith.mulf %23, %22 : vector<4x32xf32>
    %28 = arith.addf %26, %27 : vector<4x32xf32>
    %29 = math.tanh %28 : vector<4x32xf32>
    %30 = arith.mulf %25, %29 : vector<4x32xf32>
    %cst_11 = arith.constant dense<0.000000e+00> : vector<4x128xf32>
    %31 = tpu.matmul %30, %9, %cst_11 {dimension_numbers = #tpu.dot_dimension_numbers<[1], [0], [0], [1], [0, 0, 1, 1], [], []>} : vector<4x32xf32>, vector<32x128xf32>, vector<4x128xf32> -> vector<4x128xf32>
    %cst_12 = arith.constant dense<0.000000e+00> : vector<4x128xf32>
    %32 = tpu.matmul %5, %10, %cst_12 {dimension_numbers = #tpu.dot_dimension_numbers<[1], [0], [0], [1], [0, 0, 1, 1], [], []>} : vector<4x32xf32>, vector<32x128xf32>, vector<4x128xf32> -> vector<4x128xf32>
    %33 = arith.addf %31, %32 : vector<4x128xf32>
    %34 = vector.extract_strided_slice %33 {offsets = [0, 0], sizes = [4, 96], strides = [1, 1]} : vector<4x128xf32> to vector<4x96xf32>
    %35 = arith.negf %34 : vector<4x96xf32>
    %36 = math.exp %35 : vector<4x96xf32>
    %cst_13 = arith.constant 1.000000e+00 : f32
    %37 = vector.broadcast %cst_13 : f32 to vector<4x96xf32>
    %38 = arith.addf %37, %36 : vector<4x96xf32>
    %39 = arith.divf %37, %38 : vector<4x96xf32>
    %40 = vector.extract_strided_slice %33 {offsets = [0, 96], sizes = [4, 32], strides = [1, 1]} : vector<4x128xf32> to vector<4x32xf32>
    %41 = math.tanh %40 : vector<4x32xf32>
    %42 = vector.extract_strided_slice %39 {offsets = [0, 0], sizes = [4, 32], strides = [1, 1]} : vector<4x96xf32> to vector<4x32xf32>
    %43 = vector.extract_strided_slice %39 {offsets = [0, 32], sizes = [4, 32], strides = [1, 1]} : vector<4x96xf32> to vector<4x32xf32>
    %44 = vector.extract_strided_slice %39 {offsets = [0, 64], sizes = [4, 32], strides = [1, 1]} : vector<4x96xf32> to vector<4x32xf32>
    %45 = arith.mulf %43, %7 : vector<4x32xf32>
    %46 = arith.mulf %42, %41 : vector<4x32xf32>
    %47 = arith.addf %45, %46 : vector<4x32xf32>
    %48 = math.tanh %47 : vector<4x32xf32>
    %49 = arith.mulf %44, %48 : vector<4x32xf32>
    %50 = tpu.concatenate %30, %49 in 1 : vector<4x32xf32>, vector<4x32xf32> -> vector<4x64xf32>
    %51 = vector.extract_strided_slice %11 {offsets = [4, 0], sizes = [4, 128], strides = [1, 1]} : vector<16x128xf32> to vector<4x128xf32>
    %cst_14 = arith.constant dense<0.000000e+00> : vector<4x128xf32>
    %52 = tpu.matmul %30, %8, %cst_14 {dimension_numbers = #tpu.dot_dimension_numbers<[1], [0], [0], [1], [0, 0, 1, 1], [], []>} : vector<4x32xf32>, vector<32x128xf32>, vector<4x128xf32> -> vector<4x128xf32>
    %53 = arith.addf %51, %52 : vector<4x128xf32>
    %54 = vector.extract_strided_slice %53 {offsets = [0, 0], sizes = [4, 96], strides = [1, 1]} : vector<4x128xf32> to vector<4x96xf32>
    %55 = arith.negf %54 : vector<4x96xf32>
    %56 = math.exp %55 : vector<4x96xf32>
    %cst_15 = arith.constant 1.000000e+00 : f32
    %57 = vector.broadcast %cst_15 : f32 to vector<4x96xf32>
    %58 = arith.addf %57, %56 : vector<4x96xf32>
    %59 = arith.divf %57, %58 : vector<4x96xf32>
    %60 = vector.extract_strided_slice %53 {offsets = [0, 96], sizes = [4, 32], strides = [1, 1]} : vector<4x128xf32> to vector<4x32xf32>
    %61 = math.tanh %60 : vector<4x32xf32>
    %62 = vector.extract_strided_slice %59 {offsets = [0, 0], sizes = [4, 32], strides = [1, 1]} : vector<4x96xf32> to vector<4x32xf32>
    %63 = vector.extract_strided_slice %59 {offsets = [0, 32], sizes = [4, 32], strides = [1, 1]} : vector<4x96xf32> to vector<4x32xf32>
    %64 = vector.extract_strided_slice %59 {offsets = [0, 64], sizes = [4, 32], strides = [1, 1]} : vector<4x96xf32> to vector<4x32xf32>
    %65 = arith.mulf %63, %28 : vector<4x32xf32>
    %66 = arith.mulf %62, %61 : vector<4x32xf32>
    %67 = arith.addf %65, %66 : vector<4x32xf32>
    %68 = math.tanh %67 : vector<4x32xf32>
    %69 = arith.mulf %64, %68 : vector<4x32xf32>
    %cst_16 = arith.constant dense<0.000000e+00> : vector<4x128xf32>
    %70 = tpu.matmul %69, %9, %cst_16 {dimension_numbers = #tpu.dot_dimension_numbers<[1], [0], [0], [1], [0, 0, 1, 1], [], []>} : vector<4x32xf32>, vector<32x128xf32>, vector<4x128xf32> -> vector<4x128xf32>
    %cst_17 = arith.constant dense<0.000000e+00> : vector<4x128xf32>
    %71 = tpu.matmul %49, %10, %cst_17 {dimension_numbers = #tpu.dot_dimension_numbers<[1], [0], [0], [1], [0, 0, 1, 1], [], []>} : vector<4x32xf32>, vector<32x128xf32>, vector<4x128xf32> -> vector<4x128xf32>
    %72 = arith.addf %70, %71 : vector<4x128xf32>
    %73 = vector.extract_strided_slice %72 {offsets = [0, 0], sizes = [4, 96], strides = [1, 1]} : vector<4x128xf32> to vector<4x96xf32>
    %74 = arith.negf %73 : vector<4x96xf32>
    %75 = math.exp %74 : vector<4x96xf32>
    %cst_18 = arith.constant 1.000000e+00 : f32
    %76 = vector.broadcast %cst_18 : f32 to vector<4x96xf32>
    %77 = arith.addf %76, %75 : vector<4x96xf32>
    %78 = arith.divf %76, %77 : vector<4x96xf32>
    %79 = vector.extract_strided_slice %72 {offsets = [0, 96], sizes = [4, 32], strides = [1, 1]} : vector<4x128xf32> to vector<4x32xf32>
    %80 = math.tanh %79 : vector<4x32xf32>
    %81 = vector.extract_strided_slice %78 {offsets = [0, 0], sizes = [4, 32], strides = [1, 1]} : vector<4x96xf32> to vector<4x32xf32>
    %82 = vector.extract_strided_slice %78 {offsets = [0, 32], sizes = [4, 32], strides = [1, 1]} : vector<4x96xf32> to vector<4x32xf32>
    %83 = vector.extract_strided_slice %78 {offsets = [0, 64], sizes = [4, 32], strides = [1, 1]} : vector<4x96xf32> to vector<4x32xf32>
    %84 = arith.mulf %82, %47 : vector<4x32xf32>
    %85 = arith.mulf %81, %80 : vector<4x32xf32>
    %86 = arith.addf %84, %85 : vector<4x32xf32>
    %87 = math.tanh %86 : vector<4x32xf32>
    %88 = arith.mulf %83, %87 : vector<4x32xf32>
    %89 = tpu.concatenate %69, %88 in 1 : vector<4x32xf32>, vector<4x32xf32> -> vector<4x64xf32>
    %90 = vector.extract_strided_slice %11 {offsets = [8, 0], sizes = [4, 128], strides = [1, 1]} : vector<16x128xf32> to vector<4x128xf32>
    %cst_19 = arith.constant dense<0.000000e+00> : vector<4x128xf32>
    %91 = tpu.matmul %69, %8, %cst_19 {dimension_numbers = #tpu.dot_dimension_numbers<[1], [0], [0], [1], [0, 0, 1, 1], [], []>} : vector<4x32xf32>, vector<32x128xf32>, vector<4x128xf32> -> vector<4x128xf32>
    %92 = arith.addf %90, %91 : vector<4x128xf32>
    %93 = vector.extract_strided_slice %92 {offsets = [0, 0], sizes = [4, 96], strides = [1, 1]} : vector<4x128xf32> to vector<4x96xf32>
    %94 = arith.negf %93 : vector<4x96xf32>
    %95 = math.exp %94 : vector<4x96xf32>
    %cst_20 = arith.constant 1.000000e+00 : f32
    %96 = vector.broadcast %cst_20 : f32 to vector<4x96xf32>
    %97 = arith.addf %96, %95 : vector<4x96xf32>
    %98 = arith.divf %96, %97 : vector<4x96xf32>
    %99 = vector.extract_strided_slice %92 {offsets = [0, 96], sizes = [4, 32], strides = [1, 1]} : vector<4x128xf32> to vector<4x32xf32>
    %100 = math.tanh %99 : vector<4x32xf32>
    %101 = vector.extract_strided_slice %98 {offsets = [0, 0], sizes = [4, 32], strides = [1, 1]} : vector<4x96xf32> to vector<4x32xf32>
    %102 = vector.extract_strided_slice %98 {offsets = [0, 32], sizes = [4, 32], strides = [1, 1]} : vector<4x96xf32> to vector<4x32xf32>
    %103 = vector.extract_strided_slice %98 {offsets = [0, 64], sizes = [4, 32], strides = [1, 1]} : vector<4x96xf32> to vector<4x32xf32>
    %104 = arith.mulf %102, %67 : vector<4x32xf32>
    %105 = arith.mulf %101, %100 : vector<4x32xf32>
    %106 = arith.addf %104, %105 : vector<4x32xf32>
    %107 = math.tanh %106 : vector<4x32xf32>
    %108 = arith.mulf %103, %107 : vector<4x32xf32>
    %cst_21 = arith.constant dense<0.000000e+00> : vector<4x128xf32>
    %109 = tpu.matmul %108, %9, %cst_21 {dimension_numbers = #tpu.dot_dimension_numbers<[1], [0], [0], [1], [0, 0, 1, 1], [], []>} : vector<4x32xf32>, vector<32x128xf32>, vector<4x128xf32> -> vector<4x128xf32>
    %cst_22 = arith.constant dense<0.000000e+00> : vector<4x128xf32>
    %110 = tpu.matmul %88, %10, %cst_22 {dimension_numbers = #tpu.dot_dimension_numbers<[1], [0], [0], [1], [0, 0, 1, 1], [], []>} : vector<4x32xf32>, vector<32x128xf32>, vector<4x128xf32> -> vector<4x128xf32>
    %111 = arith.addf %109, %110 : vector<4x128xf32>
    %112 = vector.extract_strided_slice %111 {offsets = [0, 0], sizes = [4, 96], strides = [1, 1]} : vector<4x128xf32> to vector<4x96xf32>
    %113 = arith.negf %112 : vector<4x96xf32>
    %114 = math.exp %113 : vector<4x96xf32>
    %cst_23 = arith.constant 1.000000e+00 : f32
    %115 = vector.broadcast %cst_23 : f32 to vector<4x96xf32>
    %116 = arith.addf %115, %114 : vector<4x96xf32>
    %117 = arith.divf %115, %116 : vector<4x96xf32>
    %118 = vector.extract_strided_slice %111 {offsets = [0, 96], sizes = [4, 32], strides = [1, 1]} : vector<4x128xf32> to vector<4x32xf32>
    %119 = math.tanh %118 : vector<4x32xf32>
    %120 = vector.extract_strided_slice %117 {offsets = [0, 0], sizes = [4, 32], strides = [1, 1]} : vector<4x96xf32> to vector<4x32xf32>
    %121 = vector.extract_strided_slice %117 {offsets = [0, 32], sizes = [4, 32], strides = [1, 1]} : vector<4x96xf32> to vector<4x32xf32>
    %122 = vector.extract_strided_slice %117 {offsets = [0, 64], sizes = [4, 32], strides = [1, 1]} : vector<4x96xf32> to vector<4x32xf32>
    %123 = arith.mulf %121, %86 : vector<4x32xf32>
    %124 = arith.mulf %120, %119 : vector<4x32xf32>
    %125 = arith.addf %123, %124 : vector<4x32xf32>
    %126 = math.tanh %125 : vector<4x32xf32>
    %127 = arith.mulf %122, %126 : vector<4x32xf32>
    %128 = tpu.concatenate %108, %127 in 1 : vector<4x32xf32>, vector<4x32xf32> -> vector<4x64xf32>
    %129 = vector.extract_strided_slice %11 {offsets = [12, 0], sizes = [4, 128], strides = [1, 1]} : vector<16x128xf32> to vector<4x128xf32>
    %cst_24 = arith.constant dense<0.000000e+00> : vector<4x128xf32>
    %130 = tpu.matmul %108, %8, %cst_24 {dimension_numbers = #tpu.dot_dimension_numbers<[1], [0], [0], [1], [0, 0, 1, 1], [], []>} : vector<4x32xf32>, vector<32x128xf32>, vector<4x128xf32> -> vector<4x128xf32>
    %131 = arith.addf %129, %130 : vector<4x128xf32>
    %132 = vector.extract_strided_slice %131 {offsets = [0, 0], sizes = [4, 96], strides = [1, 1]} : vector<4x128xf32> to vector<4x96xf32>
    %133 = arith.negf %132 : vector<4x96xf32>
    %134 = math.exp %133 : vector<4x96xf32>
    %cst_25 = arith.constant 1.000000e+00 : f32
    %135 = vector.broadcast %cst_25 : f32 to vector<4x96xf32>
    %136 = arith.addf %135, %134 : vector<4x96xf32>
    %137 = arith.divf %135, %136 : vector<4x96xf32>
    %138 = vector.extract_strided_slice %131 {offsets = [0, 96], sizes = [4, 32], strides = [1, 1]} : vector<4x128xf32> to vector<4x32xf32>
    %139 = math.tanh %138 : vector<4x32xf32>
    %140 = vector.extract_strided_slice %137 {offsets = [0, 0], sizes = [4, 32], strides = [1, 1]} : vector<4x96xf32> to vector<4x32xf32>
    %141 = vector.extract_strided_slice %137 {offsets = [0, 32], sizes = [4, 32], strides = [1, 1]} : vector<4x96xf32> to vector<4x32xf32>
    %142 = vector.extract_strided_slice %137 {offsets = [0, 64], sizes = [4, 32], strides = [1, 1]} : vector<4x96xf32> to vector<4x32xf32>
    %143 = arith.mulf %141, %106 : vector<4x32xf32>
    %144 = arith.mulf %140, %139 : vector<4x32xf32>
    %145 = arith.addf %143, %144 : vector<4x32xf32>
    %146 = math.tanh %145 : vector<4x32xf32>
    %147 = arith.mulf %142, %146 : vector<4x32xf32>
    %cst_26 = arith.constant dense<0.000000e+00> : vector<4x128xf32>
    %148 = tpu.matmul %147, %9, %cst_26 {dimension_numbers = #tpu.dot_dimension_numbers<[1], [0], [0], [1], [0, 0, 1, 1], [], []>} : vector<4x32xf32>, vector<32x128xf32>, vector<4x128xf32> -> vector<4x128xf32>
    %cst_27 = arith.constant dense<0.000000e+00> : vector<4x128xf32>
    %149 = tpu.matmul %127, %10, %cst_27 {dimension_numbers = #tpu.dot_dimension_numbers<[1], [0], [0], [1], [0, 0, 1, 1], [], []>} : vector<4x32xf32>, vector<32x128xf32>, vector<4x128xf32> -> vector<4x128xf32>
    %150 = arith.addf %148, %149 : vector<4x128xf32>
    %151 = vector.extract_strided_slice %150 {offsets = [0, 0], sizes = [4, 96], strides = [1, 1]} : vector<4x128xf32> to vector<4x96xf32>
    %152 = arith.negf %151 : vector<4x96xf32>
    %153 = math.exp %152 : vector<4x96xf32>
    %cst_28 = arith.constant 1.000000e+00 : f32
    %154 = vector.broadcast %cst_28 : f32 to vector<4x96xf32>
    %155 = arith.addf %154, %153 : vector<4x96xf32>
    %156 = arith.divf %154, %155 : vector<4x96xf32>
    %157 = vector.extract_strided_slice %150 {offsets = [0, 96], sizes = [4, 32], strides = [1, 1]} : vector<4x128xf32> to vector<4x32xf32>
    %158 = math.tanh %157 : vector<4x32xf32>
    %159 = vector.extract_strided_slice %156 {offsets = [0, 0], sizes = [4, 32], strides = [1, 1]} : vector<4x96xf32> to vector<4x32xf32>
    %160 = vector.extract_strided_slice %156 {offsets = [0, 32], sizes = [4, 32], strides = [1, 1]} : vector<4x96xf32> to vector<4x32xf32>
    %161 = vector.extract_strided_slice %156 {offsets = [0, 64], sizes = [4, 32], strides = [1, 1]} : vector<4x96xf32> to vector<4x32xf32>
    %162 = arith.mulf %160, %125 : vector<4x32xf32>
    %163 = arith.mulf %159, %158 : vector<4x32xf32>
    %164 = arith.addf %162, %163 : vector<4x32xf32>
    %165 = math.tanh %164 : vector<4x32xf32>
    %166 = arith.mulf %161, %165 : vector<4x32xf32>
    %167 = tpu.concatenate %147, %166 in 1 : vector<4x32xf32>, vector<4x32xf32> -> vector<4x64xf32>
    %168 = tpu.concatenate %50, %89, %128, %167 in 0 : vector<4x64xf32>, vector<4x64xf32>, vector<4x64xf32>, vector<4x64xf32> -> vector<16x64xf32>
    %c0_29 = arith.constant 0 : index
    %c0_30 = arith.constant 0 : index
    %169 = vector.load %arg6[%c0_29, %c0_30] : memref<16x64xf32, #tpu.memory_space<vmem>>, vector<16x64xf32>
    tpu.vector_store %arg6[%c0_29, %c0_30], %168 {strides = array<i32>} : memref<16x64xf32, #tpu.memory_space<vmem>>, vector<16x64xf32>,
    %170 = tpu.concatenate %147, %166, %145, %164 in 1 : vector<4x32xf32>, vector<4x32xf32>, vector<4x32xf32>, vector<4x32xf32> -> vector<4x128xf32>
    %c0_31 = arith.constant 0 : index
    %c0_32 = arith.constant 0 : index
    %171 = vector.load %arg7[%c0_31, %c0_32] : memref<4x128xf32, #tpu.memory_space<vmem>>, vector<4x128xf32>
    tpu.vector_store %arg7[%c0_31, %c0_32], %170 {strides = array<i32>} : memref<4x128xf32, #tpu.memory_space<vmem>>, vector<4x128xf32>,
    return
  }
  func.func @transform_0(%arg0: i32) -> (i32, i32) {
    %c0_i32 = arith.constant 0 : i32
    %c0_i32_0 = arith.constant 0 : i32
    return %arg0, %c0_i32 : i32, i32
  }
  func.func @transform_1(%arg0: i32) -> (i32, i32) {
    %c0_i32 = arith.constant 0 : i32
    %c0_i32_0 = arith.constant 0 : i32
    %c0_i32_1 = arith.constant 0 : i32
    return %c0_i32, %c0_i32_0 : i32, i32
  }
  func.func @transform_2(%arg0: i32) -> (i32, i32) {
    %c0_i32 = arith.constant 0 : i32
    %c0_i32_0 = arith.constant 0 : i32
    %c0_i32_1 = arith.constant 0 : i32
    return %c0_i32, %c0_i32_0 : i32, i32
  }
  func.func @transform_3(%arg0: i32) -> (i32, i32) {
    %c0_i32 = arith.constant 0 : i32
    %c0_i32_0 = arith.constant 0 : i32
    %c0_i32_1 = arith.constant 0 : i32
    return %c0_i32, %c0_i32_0 : i32, i32
  }
  func.func @transform_4(%arg0: i32) -> (i32, i32) {
    %c0_i32 = arith.constant 0 : i32
    %c0_i32_0 = arith.constant 0 : i32
    %c0_i32_1 = arith.constant 0 : i32
    return %c0_i32, %c0_i32_0 : i32, i32
  }
  func.func @transform_5(%arg0: i32) -> (i32, i32) {
    %c0_i32 = arith.constant 0 : i32
    %c0_i32_0 = arith.constant 0 : i32
    return %arg0, %c0_i32 : i32, i32
  }
  func.func @transform_6(%arg0: i32) -> (i32, i32) {
    %c0_i32 = arith.constant 0 : i32
    %c0_i32_0 = arith.constant 0 : i32
    %c0_i32_1 = arith.constant 0 : i32
    return %c0_i32, %c0_i32_0 : i32, i32
  }
}

</mosaic_0001>

<bundles_post_ra>
// kernel: generator_forward_seq.1
= control target key start
LH: loop header
LB: loop body
LE: loop exit
PB: predicated region body
PF: predicated region fallthrough
CT: control target
= control target key end

     0   :  { %s1913_s21 = smov 0   ;;  %s2181_s0 = inlined_call_operand.vmem [shape: f32[32,128], index: 0, kind: input, shape index: {}]   ;;  %s2182_s1 = inlined_call_operand.vmem [shape: f32[4,128], index: 1, kind: input, shape index: {}]   ;;  %s2183_s2 = inlined_call_operand.vmem [shape: f32[32,128], index: 2, kind: input, shape index: {}]   ;;  %s2184_s3 = inlined_call_operand.vmem [shape: f32[32,128], index: 3, kind: input, shape index: {}]   ;;  %s2185_s4 = inlined_call_operand.vmem [shape: f32[32,128], index: 4, kind: input, shape index: {}]   ;;  %s2186_s5 = inlined_call_operand.vmem [shape: f32[32,64], index: 5, kind: output, shape index: {0}]   ;;  %s2187_s6 = inlined_call_operand.vmem [shape: f32[4,128], index: 6, kind: output, shape index: {1}]  }
   0x1 LB: > { %s1482_s22 = sadd.s32 4294967295, %s1870_s21   ;;  %p1486_p0 = scmp.ge.s32.totalorder %s1870_s21, 1  ;;  %s1870_s21 = sphi %s1913_s21, %s17_s21  }
   0x2   : > { %p211_p1 = scmp.lt.s32.totalorder %s1870_s21, 3 }
   0x4   : > { %p212_p2 = pnand %p1486_p0, %p211_p1 }
   0x5   : > { %s1487_s23 = sshll.u32 (!%p212_p2), %s1482_s22, 1  ;;  %p1491_p4 = scmp.ne.s32.totalorder (!%p212_p2), %s1482_s22, 0 }
   0x6   : > { %215 = sbr.rel (%p212_p2) target bundleno = 3566 (0xdee), region = 40  ;;  %p242_p3 = scmp.lt.s32.totalorder (!%p212_p2), %s1487_s23, 3 }
   0xd   : > { %s2189_s23 = smov (!%p242_p3, %s1487_s23), 3  ;;  %256 = sbr.rel (%p1491_p4) target bundleno = 20 (0x14), region = 44 }
   0xe   : > { %s1488_s24 = sshll.u32 %s2189_s23, 3  ;;  %v257_v0 = vld [vmem:[%s2182_s1] sm:$0xf] (!%p1491_p4) }
   0xf   : > { %s1924_s27 = scalar_lea.vmem %s2181_s0, %s1488_s24  ;;  %s1929_s30 = scalar_lea.vmem %s2186_s5, %s1488_s24  ;;  %258 = vst [vmem:[%s2187_s6] sm:$0xf] (!%p1491_p4), %v257_v0 }
  0x14 PF: > { %v260_v1 = vld [vmem:[%s2183_s2] sm:$0xff]  ;;  %v261_v2 = vld [vmem:[%s2183_s2 + $0x8] sm:$0xff]  ;;  %v262_v3 = vld [vmem:[%s2183_s2 + $0x10] sm:$0xff]  ;;  %v1872_v4 = vmov 0.0|0.0   ;;  %vm1873_vm0 = vmmov 0   ;;  %v1874_v7 = vmov 0.0  }
  0x15   : > { %1706 = vmatprep.subr.bf16.mxu1 %v1872_v4  ;;  %v1947_v5 = vpack.c.bf16 %v261_v2, %v260_v1  ;;  %v263_v6 = vld [vmem:[%s2183_s2 + $0x18] sm:$0xff]  ;;  %1582 = vmatprep.mubr.msk.f32.mxu1 %vm1873_vm0, %v1874_v7  ;;  %vm274_vm1 = vcmask 261120   ;;  %v1977_v10 = vld [vmem:[%s1924_s27] sm:$0xff]  ;;  %v269_v15 = vld [vmem:[%s2185_s4 + $0x8] sm:$0xff]  ;;  %s1875_s8 = smov 32   ;;  %s1876_s9 = smov 96  }
  0x16   : > { %1724 = vmatprep.subr.bf16.mxu0 %v1872_v4  ;;  %1615 = vmatprep.mubr.msk.f32.mxu0 %vm1873_vm0, %v1874_v7  ;;  %v1958_v8 = vpack.c.bf16 %v263_v6, %v262_v3  ;;  %v1967_v9 = vld [vmem:[%s2187_s6] sm:$0xf]  ;;  %v270_v16 = vld [vmem:[%s2185_s4 + $0x10] sm:$0xff]  ;;  %v271_v18 = vld [vmem:[%s2185_s4 + $0x18] sm:$0xff]  ;;  %s1877_s18 = smov 64   ;;  %vm1401_vm2 = vcmask 1043456  }
  0x17   : > { %1708 = vmatpush3.bf16.msra.mxu1 %v1947_v5  ;;  %1726 = vmatpush3.bf16.msra.mxu0 %v1947_v5  ;;  %v268_v14 = vld [vmem:[%s2185_s4] sm:$0xff]  ;;  %v1995_v19 = vpack.c.bf16 %v271_v18, %v270_v16  ;;  %v265_v32 = vld [vmem:[%s2184_s3 + $0x8] sm:$0xff]  ;;  %v266_v33 = vld [vmem:[%s2184_s3 + $0x10] sm:$0xff]  ;;  %vm1404_vm3 = vcmask 523264   ;;  %vm1417_vm4 = vcmask 785408  }
  0x18   : > { %1709 = vmatprep.subr.bf16.mxu1 %v1872_v4  ;;  %1727 = vmatprep.subr.bf16.mxu0 %v1872_v4  ;;  %v1989_v17 = vpack.c.bf16 %v269_v15, %v268_v14  ;;  %v264_v31 = vld [vmem:[%s2184_s3] sm:$0xff]  ;;  %v267_v35 = vld [vmem:[%s2184_s3 + $0x18] sm:$0xff] }
  0x19   : > { %v2019_v34 = vpack.c.bf16 %v265_v32, %v264_v31  ;;  %v2025_v36 = vpack.c.bf16 %v267_v35, %v266_v33 }
  0x1b   : > { %1711 = vmatpush3.bf16.msra.mxu1 %v1958_v8  ;;  %1729 = vmatpush3.bf16.msra.mxu0 %v1958_v8 }
  0x1c   : > { %1712 = vmatprep.subr.bf16.mxu1 %v1872_v4  ;;  %1730 = vmatprep.subr.bf16.mxu0 %v1872_v4 }
  0x1e   : > { %1583 = vmatmul.mubr.msk.f32.vlgmr.msra.gmra.mrb[0].mxu1 %vm274_vm1, %v1967_v9 }
  0x1f   : > { %1593 = vmatprep.mubr.msk.f32.mxu1 %vm1873_vm0, %v1874_v7  ;;  %1714 = vmatpush3.bf16.msra.mxu1 %v1989_v17 }
  0x20   : > { %1715 = vmatprep.subr.bf16.mxu1 %v1872_v4 }
  0x23   : > { %1717 = vmatpush3.bf16.msra.mxu1 %v1995_v19 }
  0x24   : > { %1718 = vmatprep.subr.bf16.mxu1 %v1872_v4 }
  0xf1   : > { %v344_v11 = vpop.f32.mrb[0].mxu1 }
  0xf2   : > { %v348_v12 = vadd.f32 %v344_v11, %v1977_v10  ;;  %v1584_v13 = vpop.f32.mrb[1].mxu1 }
  0xf4   : > { %1800 = vtanh.f32 %v348_v12  ;;  %v1493_v21 = vmul.f32 -1.442695, %v348_v12 }
  0xf6   : > { %1802 = vpow2.f32 %v1493_v21 }
  0xfe   : > { %v1801_v20 = vpop.eup %1800 }
  0xff   : > { %361 = vrot.lane.b32.xlu0 %v1801_v20, %s1875_s8  ;;  %v2096_v20 = vld [vmem:[%s1924_s27 + $0x8] sm:$0xff] }
 0x100   : > { %v1803_v22 = vpop.eup %1802 }
 0x101   : > { %v352_v23 = vadd.f32 1.0, %v1803_v22 }
 0x103   : > { %356 = vrot.lane.b32.xlu0 %v1967_v9, %s1876_s9  ;;  %1804 = vrcp.f32 %v352_v23 }
 0x10d   : > { %v1805_v24 = vpop.eup %1804 }
 0x171   : > { %v362_v25 = vpop.permute.xlu0 %361 }
 0x172   : > { %v364_v26 = vmul.f32 %v1805_v24, %v362_v25 }
 0x174   : > { %366 = vrot.lane.b32.xlu1 %v364_v26, %s1875_s8 }
 0x175   : > { %v357_v27 = vpop.permute.xlu0 %356 }
 0x176   : > { %1594 = vmatmul.mubr.msk.f32.vlgmr.msra.gmra.mrb[2].mxu1 %vm274_vm1, %v357_v27  ;;  %v359_v28 = vmul.f32 %v1805_v24, %v357_v27 }
 0x177   : > { %1604 = vmatprep.mubr.msk.f32.mxu1 %vm1873_vm0, %v1874_v7  ;;  %1720 = vmatpush3.bf16.msra.mxu1 %v2019_v34 }
 0x178   : > { %1721 = vmatprep.subr.bf16.mxu1 %v1872_v4 }
 0x17b   : > { %1723 = vmatpush3.bf16.msra.mxu1 %v2025_v36 }
 0x17c   : > { %1742 = vmatprep.subr.bf16.mxu1 %v1872_v4 }
 0x1e6   : > { %v367_v29 = vpop.permute.xlu1 %366 }
 0x1e7   : > { %v2007_v30 = vadd.f32 %v367_v29, %v359_v28 }
 0x1e9   : > { %1806 = vtanh.f32 %v2007_v30  ;;  %v638_v0 = vrot.slane %v2007_v30, 4 }
 0x1f3   : > { %v1807_v37 = vpop.eup %1806 }
 0x1f4   : > { %372 = vrot.lane.b32.xlu1 %v1807_v37, %s1875_s8 }
 0x266   : > { %v373_v38 = vpop.permute.xlu1 %372 }
 0x267   : > { %v375_v39 = vmul.f32 %v1805_v24, %v373_v38 }
 0x269   : > { %449 = vrot.lane.b32.xlu0 %v375_v39, %s1877_s18 }
 0x2db   : > { %v2032_v40 = vpop.permute.xlu0 %449 }
 0x2dc   : > { %1605 = vmatmul.mubr.msk.f32.vlgmr.msra.gmra.mrb[2].mxu1 %vm274_vm1, %v2032_v40  ;;  %1616 = vmatmul.mubr.msk.f32.vlgmr.msra.gmra.mrb[0].mxu0 %vm274_vm1, %v2032_v40 }
 0x2dd   : > { %1732 = vmatpush3.bf16.msra.mxu0 %v1989_v17  ;;  %1626 = vmatprep.mubr.msk.f32.mxu0 %vm1873_vm0, %v1874_v7 }
 0x2de   : > { %1733 = vmatprep.subr.bf16.mxu0 %v1872_v4  ;;  %1744 = vmatpush3.bf16.msra.mxu1 %v1947_v5 }
 0x2df   : > { %1745 = vmatprep.subr.bf16.mxu1 %v1872_v4  ;;  %1648 = vmatprep.mubr.msk.f32.mxu1 %vm1873_vm0, %v1874_v7 }
 0x2e1   : > { %1735 = vmatpush3.bf16.msra.mxu0 %v1995_v19 }
 0x2e2   : > { %1736 = vmatprep.subr.bf16.mxu0 %v1872_v4  ;;  %1747 = vmatpush3.bf16.msra.mxu1 %v1958_v8 }
 0x2e3   : > { %1748 = vmatprep.subr.bf16.mxu1 %v1872_v4 }
 0x3af   : > { %v519_v41 = vpop.f32.mrb[2].mxu1  ;;  %v622_v42 = vpop.f32.mrb[0].mxu0 }
 0x3b0   : > { %1808 = vtanh.f32 %v519_v41  ;;  %v627_v43 = vrot.slane %v622_v42, 4  ;;  %v1606_v44 = vpop.f32.mrb[3].mxu1  ;;  %v1617_v45 = vpop.f32.mrb[1].mxu0  ;;  %v1496_v49 = vmul.f32 -1.442695, %v519_v41 }
 0x3b2   : > { %v629_v46 = vadd.f32 %v627_v43, %v1977_v10 }
 0x3b4   : > { %1810 = vtanh.f32 %v629_v46  ;;  %v1498_v50 = vmul.f32 -1.442695, %v629_v46 }
 0x3b5   : > { %1812 = vpow2.f32 %v1496_v49 }
 0x3b6   : > { %1814 = vpow2.f32 %v1498_v50 }
 0x3ba   : > { %v1809_v47 = vpop.eup %1808 }
 0x3bb   : > { %535 = vrot.lane.b32.xlu1 %v1809_v47, %s1875_s8 }
 0x3be   : > { %v1811_v48 = vpop.eup %1810 }
 0x3bf   : > { %642 = vrot.lane.b32.xlu0 %v1811_v48, %s1875_s8  ;;  %530 = vrot.lane.b32.xlu1 %v1967_v9, %s1877_s18  ;;  %v1813_v51 = vpop.eup %1812 }
 0x3c0   : > { %v526_v52 = vadd.f32 1.0, %v1813_v51  ;;  %v1815_v53 = vpop.eup %1814 }
 0x3c1   : > { %v633_v54 = vadd.f32 1.0, %v1815_v53 }
 0x3c2   : > { %1816 = vrcp.f32 %v526_v52 }
 0x3c3   : > { %1818 = vrcp.f32 %v633_v54 }
 0x3cc   : > { %v1817_v55 = vpop.eup %1816 }
 0x3cd   : > { %v1819_v58 = vpop.eup %1818 }
 0x3ce   : > { %v640_v2 = vmul.f32 %v1819_v58, %v638_v0 }
 0x42d   : > { %v536_v56 = vpop.permute.xlu1 %535 }
 0x42e   : > { %v538_v57 = vmul.f32 %v1817_v55, %v536_v56 }
 0x430   : > { %540 = vrot.lane.b32.xlu0 %v538_v57, %s1875_s8 }
 0x431   : > { %v643_v59 = vpop.permute.xlu0 %642  ;;  %v531_v61 = vpop.permute.xlu1 %530 }
 0x432   : > { %v645_v60 = vmul.f32 %v1819_v58, %v643_v59  ;;  %v533_v62 = vmul.f32 %v1817_v55, %v531_v61 }
 0x434   : > { %647 = vrot.lane.b32.xlu1 %v645_v60, %s1875_s8 }
 0x4a2   : > { %v541_v63 = vpop.permute.xlu0 %540 }
 0x4a3   : > { %v2058_v1 = vadd.f32 %v541_v63, %v533_v62 }
 0x4a5   : > { %1820 = vtanh.f32 %v2058_v1 }
 0x4a6   : > { %v648_v3 = vpop.permute.xlu1 %647 }
 0x4a7   : > { %v2061_v6 = vadd.f32 %v648_v3, %v640_v2 }
 0x4a9   : > { %1822 = vtanh.f32 %v2061_v6  ;;  %v919_v41 = vrot.slane %v2061_v6, 4 }
 0x4af   : > { %v1821_v9 = vpop.eup %1820 }
 0x4b0   : > { %546 = vrot.lane.b32.xlu0 %v1821_v9, %s1875_s8 }
 0x4b3   : > { %v1823_v10 = vpop.eup %1822 }
 0x4b4   : > { %653 = vrot.lane.b32.xlu1 %v1823_v10, %s1875_s8 }
 0x522   : > { %v547_v11 = vpop.permute.xlu0 %546 }
 0x523   : > { %v2066_v12 = vmul.f32 %v1817_v55, %v547_v11 }
 0x525   : > { %657 = vrot.lane.b32.xlu0 %v2066_v12, %s1877_s18 }
 0x526   : > { %v654_v13 = vpop.permute.xlu1 %653 }
 0x527   : > { %v2070_v14 = vmul.f32 %v1819_v58, %v654_v13 }
 0x529   : > { %v732_v15 = vrot.slane %v2070_v14, 4 }
 0x52b   : > { %733 = vrot.lane.b32.xlu1 %v732_v15, %s1877_s18 }
 0x597   : > { %v658_v16 = vpop.permute.xlu0 %657 }
 0x598   : > { %1627 = vmatmul.mubr.msk.f32.vlgmr.msra.gmra.mrb[2].mxu0 %vm274_vm1, %v658_v16 }
 0x599   : > { %1738 = vmatpush3.bf16.msra.mxu0 %v2019_v34  ;;  %1637 = vmatprep.mubr.msk.f32.mxu0 %vm1873_vm0, %v1874_v7 }
 0x59a   : > { %1739 = vmatprep.subr.bf16.mxu0 %v1872_v4 }
 0x59d   : > { %1741 = vmatpush3.bf16.msra.mxu0 %v2025_v36  ;;  %v734_v18 = vpop.permute.xlu1 %733 }
 0x59e   : > { %1649 = vmatmul.mubr.msk.f32.vlgmr.msra.gmra.mrb[4].mxu1 %vm274_vm1, %v734_v18  ;;  %1760 = vmatprep.subr.bf16.mxu0 %v1872_v4 }
 0x59f   : > { %1750 = vmatpush3.bf16.msra.mxu1 %v1989_v17  ;;  %1659 = vmatprep.mubr.msk.f32.mxu1 %vm1873_vm0, %v1874_v7 }
 0x5a0   : > { %1638 = vmatmul.mubr.msk.f32.vlgmr.msra.gmra.mrb[2].mxu0 %vm274_vm1, %v734_v18  ;;  %1751 = vmatprep.subr.bf16.mxu1 %v1872_v4 }
 0x5a1   : > { %1762 = vmatpush3.bf16.msra.mxu0 %v1947_v5  ;;  %1681 = vmatprep.mubr.msk.f32.mxu0 %vm1873_vm0, %v1874_v7 }
 0x5a2   : > { %1763 = vmatprep.subr.bf16.mxu0 %v1872_v4 }
 0x5a3   : > { %1753 = vmatpush3.bf16.msra.mxu1 %v1995_v19 }
 0x5a4   : > { %1754 = vmatprep.subr.bf16.mxu1 %v1872_v4 }
 0x5a5   : > { %1765 = vmatpush3.bf16.msra.mxu0 %v1958_v8 }
 0x5a6   : > { %1766 = vmatprep.subr.bf16.mxu0 %v1872_v4 }
 0x671   : > { %v906_v21 = vpop.f32.mrb[4].mxu1 }
 0x672   : > { %v910_v22 = vadd.f32 %v906_v21, %v2096_v20  ;;  %v1650_v23 = vpop.f32.mrb[5].mxu1 }
 0x673   : > { %v803_v5 = vpop.f32.mrb[2].mxu0 }
 0x674   : > { %1824 = vtanh.f32 %v910_v22  ;;  %v1639_v24 = vpop.f32.mrb[3].mxu0  ;;  %v1503_v27 = vmul.f32 -1.442695, %v910_v22  ;;  %v1501_v8 = vmul.f32 -1.442695, %v803_v5 }
 0x675   : > { %1826 = vtanh.f32 %v803_v5 }
 0x676   : > { %1828 = vpow2.f32 %v1503_v27 }
 0x677   : > { %1830 = vpow2.f32 %v1501_v8 }
 0x67e   : > { %v1825_v25 = vpop.eup %1824 }
 0x67f   : > { %v1827_v26 = vpop.eup %1826  ;;  %923 = vrot.lane.b32.xlu1 %v1825_v25, %s1875_s8 }
 0x680   : > { %816 = vrot.lane.b32.xlu0 %v1827_v26, %s1875_s8  ;;  %v1829_v28 = vpop.eup %1828 }
 0x681   : > { %v1831_v29 = vpop.eup %1830  ;;  %v914_v30 = vadd.f32 1.0, %v1829_v28 }
 0x682   : > { %v810_v31 = vadd.f32 1.0, %v1831_v29 }
 0x683   : > { %1832 = vrcp.f32 %v914_v30 }
 0x684   : > { %1834 = vrcp.f32 %v810_v31 }
 0x68d   : > { %v1833_v32 = vpop.eup %1832 }
 0x68e   : > { %v1835_v35 = vpop.eup %1834  ;;  %v921_v42 = vmul.f32 %v1833_v32, %v919_v41 }
 0x68f   : > { %v814_v43 = vmul.f32 %v1835_v35, %v2058_v1 }
 0x6f1   : > { %v924_v33 = vpop.permute.xlu1 %923 }
 0x6f2   : > { %v817_v37 = vpop.permute.xlu0 %816  ;;  %v926_v38 = vmul.f32 %v1833_v32, %v924_v33 }
 0x6f3   : > { %v819_v39 = vmul.f32 %v1835_v35, %v817_v37 }
 0x6f4   : > { %928 = vrot.lane.b32.xlu1 %v926_v38, %s1875_s8 }
 0x6f5   : > { %821 = vrot.lane.b32.xlu0 %v819_v39, %s1875_s8 }
 0x766   : > { %v929_v44 = vpop.permute.xlu1 %928 }
 0x767   : > { %v822_v45 = vpop.permute.xlu0 %821  ;;  %v931_v46 = vadd.f32 %v929_v44, %v921_v42 }
 0x768   : > { %v824_v47 = vadd.f32 %v822_v45, %v814_v43 }
 0x769   : > { %1836 = vtanh.f32 %v931_v46  ;;  %v1199_v16 = vrot.slane %v931_v46, 4 }
 0x76a   : > { %1838 = vtanh.f32 %v824_v47 }
 0x773   : > { %v1837_v48 = vpop.eup %1836 }
 0x774   : > { %v1839_v49 = vpop.eup %1838  ;;  %934 = vrot.lane.b32.xlu1 %v1837_v48, %s1875_s8 }
 0x775   : > { %827 = vrot.lane.b32.xlu0 %v1839_v49, %s1875_s8 }
 0x7e6   : > { %v935_v50 = vpop.permute.xlu1 %934 }
 0x7e7   : > { %v828_v51 = vpop.permute.xlu0 %827  ;;  %v937_v52 = vmul.f32 %v1833_v32, %v935_v50 }
 0x7e8   : > { %v2107_v53 = vmul.f32 %v1835_v35, %v828_v51 }
 0x7e9   : > { %1013 = vrot.lane.b32.xlu1 %v937_v52, %s1877_s18 }
 0x7ea   : > { %938 = vrot.lane.b32.xlu0 %v2107_v53, %s1877_s18 }
 0x85b   : > { %v2112_v54 = vpop.permute.xlu1 %1013 }
 0x85c   : > { %v939_v55 = vpop.permute.xlu0 %938  ;;  %1682 = vmatmul.mubr.msk.f32.vlgmr.msra.gmra.mrb[4].mxu0 %vm274_vm1, %v2112_v54 }
 0x85d   : > { %1660 = vmatmul.mubr.msk.f32.vlgmr.msra.gmra.mrb[6].mxu1 %vm274_vm1, %v939_v55  ;;  %1768 = vmatpush3.bf16.msra.mxu0 %v1989_v17 }
 0x85e   : > { %1756 = vmatpush3.bf16.msra.mxu1 %v2019_v34  ;;  %1670 = vmatprep.mubr.msk.f32.mxu1 %vm1873_vm0, %v1874_v7 }
 0x85f   : > { %1757 = vmatprep.subr.bf16.mxu1 %v1872_v4  ;;  %1769 = vmatprep.subr.bf16.mxu0 %v1872_v4 }
 0x860   : > { %1692 = vmatprep.mubr.msk.f32.mxu0 %vm1873_vm0, %v1874_v7 }
 0x861   : > { %1771 = vmatpush3.bf16.msra.mxu0 %v1995_v19 }
 0x862   : > { %1759 = vmatpush3.bf16.msra.mxu1 %v2025_v36  ;;  %1772 = vmatprep.subr.bf16.mxu0 %v1872_v4 }
 0x865   : > { %1671 = vmatmul.mubr.msk.f32.vlgmr.msra.gmra.mrb[6].mxu1 %vm274_vm1, %v2112_v54 }
 0x92f   : > { %v1183_v17 = vpop.f32.mrb[4].mxu0 }
 0x930   : > { %v1188_v56 = vrot.slane %v1183_v17, 4  ;;  %v1683_v57 = vpop.f32.mrb[5].mxu0 }
 0x932   : > { %v1190_v58 = vadd.f32 %v1188_v56, %v2096_v20 }
 0x934   : > { %1840 = vtanh.f32 %v1190_v58  ;;  %v1508_v62 = vmul.f32 -1.442695, %v1190_v58 }
 0x938   : > { %v1083_v59 = vpop.f32.mrb[6].mxu1 }
 0x939   : > { %1842 = vtanh.f32 %v1083_v59  ;;  %v1672_v60 = vpop.f32.mrb[7].mxu1  ;;  %v1506_v63 = vmul.f32 -1.442695, %v1083_v59 }
 0x93a   : > { %1844 = vpow2.f32 %v1508_v62 }
 0x93b   : > { %1846 = vpow2.f32 %v1506_v63 }
 0x93e   : > { %v1841_v61 = vpop.eup %1840 }
 0x93f   : > { %1203 = vrot.lane.b32.xlu1 %v1841_v61, %s1875_s8 }
 0x943   : > { %v1843_v19 = vpop.eup %1842 }
 0x944   : > { %1096 = vrot.lane.b32.xlu0 %v1843_v19, %s1875_s8  ;;  %v1845_v0 = vpop.eup %1844 }
 0x945   : > { %v1194_v1 = vadd.f32 1.0, %v1845_v0  ;;  %v1847_v2 = vpop.eup %1846 }
 0x946   : > { %v1090_v3 = vadd.f32 1.0, %v1847_v2 }
 0x947   : > { %1848 = vrcp.f32 %v1194_v1 }
 0x948   : > { %1850 = vrcp.f32 %v1090_v3 }
 0x951   : > { %v1849_v6 = vpop.eup %1848 }
 0x952   : > { %v1851_v11 = vpop.eup %1850  ;;  %v1201_v18 = vmul.f32 %v1849_v6, %v1199_v16 }
 0x953   : > { %v1094_v22 = vmul.f32 %v1851_v11, %v824_v47 }
 0x9b1   : > { %v1204_v9 = vpop.permute.xlu1 %1203 }
 0x9b2   : > { %v1206_v10 = vmul.f32 %v1849_v6, %v1204_v9 }
 0x9b4   : > { %1208 = vrot.lane.b32.xlu1 %v1206_v10, %s1875_s8 }
 0x9b6   : > { %v1097_v13 = vpop.permute.xlu0 %1096 }
 0x9b7   : > { %v1099_v15 = vmul.f32 %v1851_v11, %v1097_v13 }
 0x9b9   : > { %1101 = vrot.lane.b32.xlu0 %v1099_v15, %s1875_s8 }
 0xa26   : > { %v1209_v20 = vpop.permute.xlu1 %1208 }
 0xa27   : > { %v2135_v21 = vadd.f32 %v1209_v20, %v1201_v18 }
 0xa29   : > { %1852 = vtanh.f32 %v2135_v21 }
 0xa2b   : > { %v1102_v23 = vpop.permute.xlu0 %1101 }
 0xa2c   : > { %v1104_v5 = vadd.f32 %v1102_v23, %v1094_v22 }
 0xa2e   : > { %1854 = vtanh.f32 %v1104_v5 }
 0xa33   : > { %v1853_v24 = vpop.eup %1852 }
 0xa34   : > { %1214 = vrot.lane.b32.xlu1 %v1853_v24, %s1875_s8 }
 0xa38   : > { %v1855_v25 = vpop.eup %1854 }
 0xa39   : > { %1107 = vrot.lane.b32.xlu0 %v1855_v25, %s1875_s8 }
 0xaa6   : > { %v1215_v26 = vpop.permute.xlu1 %1214 }
 0xaa7   : > { %v1217_v27 = vmul.f32 %v1849_v6, %v1215_v26 }
 0xaa9   : > { %v1293_v8 = vrot.slane %v1217_v27, 4 }
 0xaab   : > { %v1108_v28 = vpop.permute.xlu0 %1107  ;;  %1294 = vrot.lane.b32.xlu1 %v1293_v8, %s1877_s18 }
 0xaac   : > { %v1110_v29 = vmul.f32 %v1851_v11, %v1108_v28 }
 0xaae   : > { %1218 = vrot.lane.b32.xlu0 %v1110_v29, %s1877_s18 }
 0xb1d   : > { %v1295_v31 = vpop.permute.xlu1 %1294 }
 0xb20   : > { %v1219_v30 = vpop.permute.xlu0 %1218 }
 0xb21   : > { %1693 = vmatmul.mubr.msk.f32.vlgmr.msra.gmra.mrb[6].mxu0 %vm274_vm1, %v1219_v30 }
 0xb22   : > { %1774 = vmatpush3.bf16.msra.mxu0 %v2019_v34  ;;  %1703 = vmatprep.mubr.msk.f32.mxu0 %vm1873_vm0, %v1874_v7 }
 0xb23   : > { %1775 = vmatprep.subr.bf16.mxu0 %v1872_v4  ;;  %v835_v4 = vrot.slane %v2107_v53, 4 }
 0xb26   : > { %1777 = vmatpush3.bf16.msra.mxu0 %v2025_v36 }
 0xb29   : > { %1704 = vmatmul.mubr.msk.f32.vlgmr.msra.gmra.mrb[6].mxu0 %vm274_vm1, %v1295_v31 }
 0xbfc   : > { %v1364_v32 = vpop.f32.mrb[6].mxu0 }
 0xbfd   : > { %1856 = vtanh.f32 %v1364_v32  ;;  %v1705_v33 = vpop.f32.mrb[7].mxu0  ;;  %v1511_v37 = vmul.f32 -1.442695, %v1364_v32 }
 0xbff   : > { %1858 = vpow2.f32 %v1511_v37 }
 0xc07   : > { %v1857_v35 = vpop.eup %1856 }
 0xc08   : > { %1377 = vrot.lane.b32.xlu0 %v1857_v35, %s1875_s8 }
 0xc09   : > { %v1859_v38 = vpop.eup %1858 }
 0xc0a   : > { %v1371_v34 = vadd.f32 1.0, %v1859_v38 }
 0xc0c   : > { %1860 = vrcp.f32 %v1371_v34 }
 0xc16   : > { %v1861_v39 = vpop.eup %1860 }
 0xc17   : > { %v1375_v36 = vmul.f32 %v1861_v39, %v1104_v5 }
 0xc7a   : > { %v1378_v7 = vpop.permute.xlu0 %1377 }
 0xc7b   : > { %v1380_v41 = vmul.f32 %v1861_v39, %v1378_v7 }
 0xc7d   : > { %1382 = vrot.lane.b32.xlu1 %v1380_v41, %s1875_s8 }
 0xc81   : > { %552 = vrot.lane.b32.xlu1 %v2066_v12, %s1876_s9 }
 0xc85   : > { %836 = vrot.lane.b32.xlu1 %v835_v4, %s1876_s9 }
 0xcef   : > { %v1383_v42 = vpop.permute.xlu1 %1382 }
 0xcf0   : > { %v1385_v43 = vadd.f32 %v1383_v42, %v1375_v36 }
 0xcf2   : > { %1862 = vtanh.f32 %v1385_v43  ;;  %v1412_v12 = vrot.slane %v1385_v43, 4 }
 0xcf3   : > { %v553_v45 = vpop.permute.xlu1 %552 }
 0xcf7   : > { %v837_v49 = vpop.permute.xlu1 %836 }
 0xcfc   : > { %v1863_v44 = vpop.eup %1862 }
 0xcfd   : > { %1388 = vrot.lane.b32.xlu0 %v1863_v44, %s1875_s8 }
 0xd01   : > { %831 = vrot.lane.b32.xlu0 %v2070_v14, %s1877_s18  ;;  %v555_v14 = vsel %vm274_vm1, %v2032_v40, %v553_v45 }
 0xd05   : > { %1392 = vrot.lane.b32.xlu0 %v1217_v27, %s1877_s18 }
 0xd09   : > { %1113 = vrot.lane.b32.xlu0 %v1110_v29, %s1876_s9 }
 0xd0d   : > { %1413 = vrot.lane.b32.xlu0 %v1412_v12, %s1877_s18 }
 0xd6f   : > { %v1389_v46 = vpop.permute.xlu0 %1388 }
 0xd70   : > { %v1391_v47 = vmul.f32 %v1861_v39, %v1389_v46 }
 0xd72   : > { %v1396_v48 = vrot.slane %v1391_v47, 4 }
 0xd73   : > { %v832_v50 = vpop.permute.xlu0 %831 }
 0xd74   : > { %v839_v51 = vsel %vm274_vm1, %v832_v50, %v837_v49  ;;  %1397 = vrot.lane.b32.xlu1 %v1396_v48, %s1876_s9 }
 0xd75   : > { %v1402_v52 = vsel %vm1401_vm2, %v555_v14, %v839_v51 }
 0xd76   : > { %1405 = vst.msk [vmem:[%s1929_s30] sm:$0xff] %vm1404_vm3, %v1402_v52 }
 0xd77   : > { %v1393_v53 = vpop.permute.xlu0 %1392 }
 0xd78   : > { %1408 = vrot.lane.b32.xlu1 %v2135_v21, %s1875_s8 }
 0xd7b   : > { %v1114_v55 = vpop.permute.xlu0 %1113 }
 0xd7c   : > { %v1116_v56 = vsel %vm274_vm1, %v2112_v54, %v1114_v55 }
 0xd7f   : > { %v1414_v59 = vpop.permute.xlu0 %1413 }
 0xde6   : > { %v1398_v17 = vpop.permute.xlu1 %1397 }
 0xde7   : > { %v1400_v57 = vsel %vm274_vm1, %v1393_v53, %v1398_v17 }
 0xde8   : > { %v1403_v58 = vsel %vm1401_vm2, %v1116_v56, %v1400_v57 }
 0xde9   : > { %1406 = vst.msk [vmem:[%s1929_s30 + $0x8] sm:$0xff] %vm1404_vm3, %v1403_v58 }
 0xdea   : > { %v1409_v40 = vpop.permute.xlu1 %1408 }
 0xdeb   : > { %v1416_v60 = vsel %vm1404_vm3, %v1400_v57, %v1409_v40 }
 0xdec   : > { %v1418_v61 = vsel %vm1417_vm4, %v1416_v60, %v1414_v59 }
 0xded   : > { %1419 = vst [vmem:[%s2187_s6 - $0x4] sm:$0xf0] %v1418_v61 }
 0xdee PF: > { %s17_s21 = sadd.s32 1, %s1870_s21  }
 0xdef   : > { %p14_p5 = scmp.ge.s32.totalorder %s17_s21, 4  }
 0xdf1   :  { %16 = sbr.rel (!%p14_p5) target bundleno = 1 (0x1), region = 82 }

</bundles_post_ra>
